<compile_context>
chip_gen: v5e
topology: v5e:2x2
jax: 0.10.0
libtpu: 0.0.40
codegen_flags: <defaults>
</compile_context>

<pallas_src>
import jax
import jax.numpy as jnp
from jax.experimental import pallas as pl
from jax.experimental.pallas import tpu as pltpu


def _embed_kernel(p_ref, w_ref, pos_ref, o_ref):
    # p_ref:   (bn, K) bf16   im2col patches for one image block
    # w_ref:   (K, D)  bf16   flattened conv weight, feature order (c, kh, kw)
    # pos_ref: (bn, D) f32    position embedding with conv bias pre-folded
    # o_ref:   (bn, D)        output block
    acc = jnp.dot(p_ref[...], w_ref[...],
                  preferred_element_type=jnp.float32)      # MXU, f32 acc
    o_ref[...] = (acc + pos_ref[...]).astype(o_ref.dtype)  # f32 epilogue


def _block_bytes(bn, K, D, out_bytes):
    # double-buffered patches + pos + out, plus double-buffered weight
    return 2 * (bn * K * 2 + bn * D * 4 + bn * D * out_bytes) + 2 * K * D * 2


def _choose_n_block(N, K, D, out_bytes, budget=24 * 1024 * 1024):
    """Largest legal N block: whole image if it fits VMEM, else an 8-aligned
    divisor of N.  Full-extent blocks are always (8,128)-legal."""
    if _block_bytes(N, K, D, out_bytes) <= budget:
        return N, 1
    for g in range(2, N + 1):
        if N % g == 0:
            bn = N // g
            if bn % 8 == 0 and _block_bytes(bn, K, D, out_bytes) <= budget:
                return bn, g
    return N, 1  # fall back: whole image (legal), rely on vmem_limit headroom


def siglip_vision_embeddings(pixel_values, conv_weight, conv_bias, pos_embedding,
                             patch_size, out_dtype=None):
    """pixel_values: (B, C, H, W) float32 (NCHW, like PyTorch).
    conv_weight:  (D, C, P, P)
    conv_bias:    (D,)
    pos_embedding:(N, D) with N = (H//P)*(W//P)
    returns:      (B, N, D)
    """
    B, C, H, W = pixel_values.shape
    P = patch_size
    D = conv_weight.shape[0]
    nH, nW = H // P, W // P
    N = nH * nW
    K = C * P * P
    out_dtype = pixel_values.dtype if out_dtype is None else out_dtype
    out_bytes = jnp.dtype(out_dtype).itemsize

    # --- wrapper-side im2col: one XLA reshape/transpose, feature order (c, kh, kw)
    patches = pixel_values.reshape(B, C, nH, P, nW, P)
    patches = patches.transpose(0, 2, 4, 1, 3, 5).reshape(B, N, K)
    patches = patches.astype(jnp.bfloat16)                           # (B, N, K)

    # Flattened conv weight, feature order (c, kh, kw); shipped as bf16.
    w_flat = conv_weight.reshape(D, K).T.astype(jnp.bfloat16)        # (K, D)

    # Fold conv bias into the position table (one-time (N, D) add); keep f32.
    pos_pb = (pos_embedding.astype(jnp.float32)
              + conv_bias.astype(jnp.float32)[None, :])              # (N, D)

    bn, G = _choose_n_block(N, K, D, out_bytes)

    grid_spec = pltpu.PrefetchScalarGridSpec(
        num_scalar_prefetch=0,
        grid=(B, G),
        in_specs=[
            # (bn, K) bf16 patch block for image b.
            pl.BlockSpec((pl.Squeezed(), bn, K), lambda b, g: (b, g, 0)),
            # Full weight, constant index across the grid.
            pl.BlockSpec((K, D), lambda b, g: (0, 0)),
            # Position (+bias) block, shared across the batch axis.
            pl.BlockSpec((bn, D), lambda b, g: (g, 0)),
        ],
        out_specs=pl.BlockSpec((pl.Squeezed(), bn, D), lambda b, g: (b, g, 0)),
    )

    vmem_limit = min(max(3 * _block_bytes(bn, K, D, out_bytes),
                         32 * 1024 * 1024),
                     64 * 1024 * 1024)

    return pl.pallas_call(
        _embed_kernel,
        out_shape=jax.ShapeDtypeStruct((B, N, D), out_dtype),
        grid_spec=grid_spec,
        compiler_params=pltpu.CompilerParams(
            dimension_semantics=("parallel", "parallel"),
            vmem_limit_bytes=vmem_limit),
    )(patches, w_flat, pos_pb)


def reference(pixel_values, conv_weight, conv_bias, pos_embedding, patch_size):
    """Pure-JAX reference mirroring the PyTorch forward (ndim==4, Conv2d path)."""
    patch_embeds = jax.lax.conv_general_dilated(
        pixel_values, conv_weight,
        window_strides=(patch_size, patch_size),
        padding='VALID',
        dimension_numbers=('NCHW', 'OIHW', 'NCHW'))
    patch_embeds = patch_embeds + conv_bias[None, :, None, None]
    B, D, h, w = patch_embeds.shape
    emb = patch_embeds.reshape(B, D, h * w).transpose(0, 2, 1)  # flatten(2).T
    return emb + pos_embedding[None, :, :]


if __name__ == "__main__":
    # Small config consistent with the module:
    #   num_channels=3, image_size=16, patch_size=4, hidden_size=32
    B, C, H, W = 2, 3, 16, 16
    P = 4
    D = 32
    N = (H // P) * (W // P)   # 16 patches == num_positions

    key = jax.random.PRNGKey(0)
    k_px, k_w, k_b, k_pos = jax.random.split(key, 4)
    pixel_values = jax.random.normal(k_px, (B, C, H, W), dtype=jnp.float32)
    conv_weight = jax.random.normal(k_w, (D, C, P, P), dtype=jnp.float32) * 0.05
    conv_bias = jax.random.normal(k_b, (D,), dtype=jnp.float32) * 0.05
    pos_embedding = jax.random.normal(k_pos, (N, D), dtype=jnp.float32) * 0.02

    out = siglip_vision_embeddings(pixel_values, conv_weight, conv_bias,
                                   pos_embedding, P)
    out = jax.block_until_ready(out)

    ref = reference(pixel_values, conv_weight, conv_bias, pos_embedding, P)
    assert out.shape == (B, N, D), out.shape
    # bf16 matmul inputs (f32 accumulation) -> slightly relaxed tolerance.
    assert jnp.allclose(out, ref, atol=2e-2, rtol=2e-2), \
        float(jnp.max(jnp.abs(out - ref)))

    print("KERNEL_OK")
</pallas_src>

<mosaic_0001>
module attributes {stable_mosaic.version = 11 : i64} {
  func.func @_embed_kernel(%arg0: i32, %arg1: i32, %arg2: memref<1x16x48xbf16, #tpu.memory_space<vmem>>, %arg3: memref<48x32xbf16, #tpu.memory_space<vmem>>, %arg4: memref<16x32xf32, #tpu.memory_space<vmem>>, %arg5: memref<1x16x32xf32, #tpu.memory_space<vmem>>) attributes {dimension_semantics = [#tpu.dimension_semantics<parallel>, #tpu.dimension_semantics<parallel>], iteration_bounds = array<i64: 2, 1>, scalar_prefetch = 0 : i64, scratch_operands = 0 : i64, tpu.core_type = #tpu.core_type<tc>, window_params = [{transform_indices = @transform_0, window_bounds = array<i64: 1, 16, 48>}, {pipeline_mode = #tpu.pipeline_mode<synchronous>, transform_indices = @transform_1, window_bounds = array<i64: 48, 32>}, {transform_indices = @transform_2, window_bounds = array<i64: 16, 32>}, {transform_indices = @transform_3, window_bounds = array<i64: 1, 16, 32>}]} {
    %c0 = arith.constant 0 : index
    %c0_0 = arith.constant 0 : index
    %c0_1 = arith.constant 0 : index
    %0 = vector.load %arg2[%c0, %c0_0, %c0_1] : memref<1x16x48xbf16, #tpu.memory_space<vmem>>, vector<1x16x48xbf16>
    %1 = vector.shape_cast %0 : vector<1x16x48xbf16> to vector<16x48xbf16>
    %c0_2 = arith.constant 0 : index
    %c0_3 = arith.constant 0 : index
    %2 = vector.load %arg3[%c0_2, %c0_3] : memref<48x32xbf16, #tpu.memory_space<vmem>>, vector<48x32xbf16>
    %cst = arith.constant dense<0.000000e+00> : vector<16x32xf32>
    %3 = tpu.matmul %1, %2, %cst {dimension_numbers = #tpu.dot_dimension_numbers<[1], [0], [0], [1], [0, 0, 1, 1], [], []>} : vector<16x48xbf16>, vector<48x32xbf16>, vector<16x32xf32> -> vector<16x32xf32>
    %c0_4 = arith.constant 0 : index
    %c0_5 = arith.constant 0 : index
    %4 = vector.load %arg4[%c0_4, %c0_5] : memref<16x32xf32, #tpu.memory_space<vmem>>, vector<16x32xf32>
    %5 = arith.addf %3, %4 : vector<16x32xf32>
    %c0_6 = arith.constant 0 : index
    %c0_7 = arith.constant 0 : index
    %c0_8 = arith.constant 0 : index
    %6 = vector.load %arg5[%c0_6, %c0_7, %c0_8] : memref<1x16x32xf32, #tpu.memory_space<vmem>>, vector<1x16x32xf32>
    %7 = vector.shape_cast %6 : vector<1x16x32xf32> to vector<16x32xf32>
    %8 = vector.shape_cast %5 : vector<16x32xf32> to vector<1x16x32xf32>
    tpu.vector_store %arg5[%c0_6, %c0_7, %c0_8], %8 {strides = array<i32>} : memref<1x16x32xf32, #tpu.memory_space<vmem>>, vector<1x16x32xf32>,
    return
  }
  func.func @transform_0(%arg0: i32, %arg1: i32) -> (i32, i32, i32) {
    %c0_i32 = arith.constant 0 : i32
    %c0_i32_0 = arith.constant 0 : i32
    return %arg0, %arg1, %c0_i32 : i32, i32, i32
  }
  func.func @transform_1(%arg0: i32, %arg1: i32) -> (i32, i32) {
    %c0_i32 = arith.constant 0 : i32
    %c0_i32_0 = arith.constant 0 : i32
    %c0_i32_1 = arith.constant 0 : i32
    return %c0_i32, %c0_i32_0 : i32, i32
  }
  func.func @transform_2(%arg0: i32, %arg1: i32) -> (i32, i32) {
    %c0_i32 = arith.constant 0 : i32
    %c0_i32_0 = arith.constant 0 : i32
    return %arg1, %c0_i32 : i32, i32
  }
  func.func @transform_3(%arg0: i32, %arg1: i32) -> (i32, i32, i32) {
    %c0_i32 = arith.constant 0 : i32
    %c0_i32_0 = arith.constant 0 : i32
    return %arg0, %arg1, %c0_i32 : i32, i32, i32
  }
}

</mosaic_0001>

<bundles_post_ra>
// kernel: tpu_custom_call.1
= control target key start
LH: loop header
LB: loop body
LE: loop exit
PB: predicated region body
PF: predicated region fallthrough
CT: control target
= control target key end

     0   :  { %8 = vsyncpa [#allocation3], 0  ;;  %s697_s0 = inlined_call_operand.vmem [shape: bf16[2,16,48], index: 0, kind: input, shape index: {}]   ;;  %s698_s1 = inlined_call_operand.vmem [shape: bf16[48,32], index: 1, kind: input, shape index: {}]   ;;  %s699_s2 = inlined_call_operand.vmem [shape: f32[16,32], index: 2, kind: input, shape index: {}]   ;;  %s700_s3 = inlined_call_operand.hbm [shape: f32[2,16,32], index: 3, kind: output, shape index: {}]  }
   0x1   :  { %10 = vsyncpa [#allocation3 + $0x1], 0  ;;  %s585_s12 = smov 0   ;;  %s587_s13 = smov 0  }
   0x2   :  { %s589_s14 = smov 0   ;;  %s591_s15 = smov 0  }
   0x3   :  { %s593_s16 = smov 0   ;;  %s595_s17 = smov 0  }
   0x4 LB: > { %s389_s18 = sadd.s32 4294967295, %s561_s17   ;;  %s390_s19 = sadd.s32 4294967294, %s561_s17   ;;  %s561_s17 = sphi %s595_s17, %s16_s17   ;;  %s557_s16 = sphi %s593_s16, %s707_s16   ;;  %s553_s15 = sphi %s591_s15, %s706_s15   ;;  %s549_s14 = sphi %s589_s14, %s705_s14   ;;  %s545_s13 = sphi %s587_s13, %s704_s13   ;;  %s541_s12 = sphi %s585_s12, %s703_s12  }
   0x5   : > { %s28_s20 = sadd.s32 1, %s557_s16  ;;  %s112_s21 = sadd.s32 1, %s549_s14 }
   0x6   : > { %p30_p0 = scmp.ge.s32.totalorder %s28_s20, 2  ;;  %p122_p1 = scmp.ne.s32.totalorder %s549_s14, %s545_s13 }
   0x7   : > { %p123_p2 = scmp.eq.s32.totalorder %s389_s18, 1  ;;  %p128_p3 = scmp.ne.s32.totalorder %s545_s13, %s541_s12 }
   0x8   : > { %s709_s20 = smov (%p30_p0, %s28_s20), 0  ;;  %p129_p5 = scmp.eq.s32.totalorder %s390_s19, 1 }
   0x9   : > { %p625_p4 = por %p123_p2, %p122_p1  ;;  %s107_s23 = ssub.s32 %s557_s16, %s709_s20 }
   0xa   : > { %p394_p6 = scmp.ge.s32.totalorder %s561_s17, 1  ;;  %p110_p7 = scmp.eq.s32.totalorder %s107_s23, 0 }
   0xb   : > { %p632_p8 = por %p129_p5, %p128_p3  ;;  %p172_p9 = scmp.lt.s32.totalorder %s561_s17, 3 }
   0xc   : > { %s638_s25 = scalar_select %p110_p7, %s549_s14, %s112_s21  }
   0xd   : > { %p173_p10 = pnand %p394_p6, %p172_p9 }
   0xe   : > { %p206_p11 = scmp.lt.s32.totalorder (!%p173_p10), %s553_s15, 1  ;;  %s202_s10 = sand.u32 (!%p173_p10), 1, %s545_s13  }
   0xf   : > { %176 = sbr.rel (%p173_p10) target bundleno = 172 (0xac), region = 32  ;;  %s395_s11 = sshll.u32 (!%p173_p10), %s202_s10, 4 }
  0x10   : > { %s425_s21 = sshll.u32 (!%p173_p10), %s553_s15, 4  ;;  %s204_s28 = scalar_lea.vmem (!%p173_p10), [#allocation2], %s395_s11 }
  0x11   : > { %s291_s27 = scalar_lea.hbm (!%p173_p10), %s700_s3, %s425_s21  ;;  %s292_s29 = sshll.u32 (!%p173_p10), %s204_s28, 4  ;;  %s293_s29 = int_to_ptr.vmem [resolvable:$true] %s292_s29 }
  0x12   : > { %s503_s11 = scalar_lea.hbm (!%p173_p10), %s700_s3, 32 }
  0x14   : > { %v424_v0 = vld [vmem:[%s698_s1 + $0x10] sm:$0xff]  ;;  %v423_v1 = vld [vmem:[%s698_s1 + $0x8] sm:$0xff]  ;;  %s207_s30 = scalar_select %p206_p11, %s553_s15, 1  ;;  %v422_v2 = vld [vmem:[%s698_s1] sm:$0xff]  ;;  %vm256_vm0 = vcmask 392192   ;;  %vm274_vm1 = vcmask 261120  }
  0x15   : > { %265 = vmatpush.bf16.msra.mxu0 %v424_v0  ;;  %v231_v4 = vld [vmem:[%s699_s2] sm:$0xff]  ;;  %v232_v7 = vld [vmem:[%s699_s2 + $0x8] sm:$0xff]  ;;  %s278_s15 = scalar_lea.sflag [#allocation3], %s202_s10 }
  0x16   : > { %s420_s4 = sshll.u32 %s207_s30, 3  ;;  %s294_s30 = sshll.u32 %s291_s27, 4  ;;  %s295_s30 = int_to_ptr.hbm [resolvable:$true] %s294_s30 }
  0x17   : > { %s213_s9 = scalar_lea.vmem %s697_s0, %s420_s4  ;;  %s497_s6 = sshra.s32 %s295_s30, 4  ;;  %s498_s6 = int_to_ptr.hbm [resolvable:$true] %s497_s6 }
  0x18   : > { %v421_v3 = vld [vmem:[%s213_s9] sm:$0xff]  ;;  %s499_s7 = scalar_lea.hbm %s498_s6, 16  ;;  %p504_p1 = scmp.lt.s32.totalorder %s498_s6, %s700_s3 }
  0x19   : > { %266 = vmatpush.bf16.msra.mxu0 %v423_v1  ;;  %p500_p12 = scmp.ne.s32.totalorder %s498_s6, %s499_s7  ;;  %p505_p2 = scmp.lt.s32.totalorder %s503_s11, %s499_s7 }
  0x1b   : > { %p501_p13 = pnand %p500_p12, %p625_p4  ;;  %p506_p3 = por %p505_p2, %p504_p1 }
  0x1d   : > { %267 = vmatpush.bf16.msra.mxu0 %v422_v2  ;;  %p502_p0 = pneg %p501_p13 }
  0x1f   : > { %p507_p5 = pnand %p506_p3, %p502_p0 }
  0x20   : > { %414 = vmatmul.msk.bf16.vlgmr.msra.gmra.mxu0 %vm256_vm0, %v421_v3 }
  0x9d   : > { %v269_v5 = vpop.f32.mrf.mxu0 }
  0x9e   : > { %v270_v6 = vadd.f32 %v269_v5, %v231_v4 }
  0xa0   : > { %275 = vst.msk [vmem:[%s204_s28] sm:$0xff] %vm274_vm1, %v270_v6 }
  0xa5   : > { %v271_v8 = vpop.f32.mrf.mxu0 }
  0xa6   : > { %v272_v9 = vadd.f32 %v271_v8, %v232_v7 }
  0xa8   : > { %276 = vst.msk [vmem:[%s204_s28 + $0x8] sm:$0xff] %vm274_vm1, %v272_v9 }
  0xa9   : > { %510 = shalt.err (!%p507_p5)
}
  0xaa   : > { %s563_s10 = smov 128   ;;  %s564_s21 = smov 8  }
  0xab   : > { %426 = dma.vmem_to_hbm [thread:$0]  (%p625_p4), %s293_s29, 256, %s295_s30, %s278_s15, %s563_s10, %s563_s10, %s564_s21  }
  0xac PF: > { %p432_p6 = scmp.ge.s32.totalorder %s561_s17, 2  ;;  %s309_s23 = sand.u32 1, %s541_s12  }
  0xad   : > { %s310_s26 = scalar_lea.sflag [#allocation3], %s309_s23 }
  0xae   : > { %p429_p7 = pnand %p432_p6, %p632_p8 }
  0xb0   : > { %p430_p9 = pneg %p429_p7 }
  0xb2   : > { %536 = dma.done.wait (%p430_p9), %s310_s26, 256  }
  0xb3   : > { %538 = vsyncadd (%p430_p9), %s310_s26, 4294967040  ;;  %s16_s17 = sadd.s32 1, %s561_s17   ;;  %s703_s12 = smov %s545_s13 }
  0xb4   : > { %p13_p10 = scmp.ge.s32.totalorder %s16_s17, 4   ;;  %s704_s13 = smov %s549_s14 }
  0xb5   : > { %s705_s14 = smov %s638_s25  ;;  %s706_s15 = smov %s557_s16 }
  0xb6   : > { %s707_s16 = smov %s709_s20  ;;  %15 = sbr.rel (!%p13_p10) target bundleno = 4 (0x4), region = 70 }
  0xbb   :  { %316 = vsyncpa [#allocation3], 1 }
  0xbc   :  { %318 = vsyncpa [#allocation3 + $0x1], 1 }

</bundles_post_ra>
